<compile_context>
chip_gen: v7x
topology: tpu7x:2x2x1
jax: 0.10.0
libtpu: 0.0.40
codegen_flags: <defaults>
</compile_context>

<pallas_src>
import functools

import jax
import jax.numpy as jnp
from jax.experimental import pallas as pl
from jax.experimental.pallas import tpu as pltpu


def _round_up(a, b):
    return ((a + b - 1) // b) * b


def _vmem_budget_and_limit():
    """(budget for pipelined tiles, scoped-VMEM limit) per TPU generation."""
    cap = 128 * 1024 * 1024
    try:
        cap = int(pltpu.get_tpu_info().vmem_capacity_bytes)
    except Exception:
        pass
    if cap <= 64 * 1024 * 1024:
        # v7x-class: 64 MiB physical per TensorCore -> leave headroom.
        return 40 * 1024 * 1024, 56 * 1024 * 1024
    # v5e / v6e: 128 MiB physical; default scoped limit (16/32 MiB) is too low
    # for 512-1024-row tiles at large C, so raise it explicitly.
    return 64 * 1024 * 1024, 96 * 1024 * 1024


def layernorm_kernel(w_ref, b_ref, x_ref, o_ref, *, eps):
    """Plain path: one logical row per physical row (lane dim == C)."""
    x = x_ref[...].astype(jnp.float32)
    mean = jnp.mean(x, axis=-1, keepdims=True)
    xc = x - mean
    var = jnp.mean(xc * xc, axis=-1, keepdims=True) + eps
    inv = jax.lax.rsqrt(var)                      # EUP rsqrt (free slot)
    w = w_ref[...].astype(jnp.float32)
    b = b_ref[...].astype(jnp.float32)
    o_ref[...] = (xc * inv * w + b).astype(o_ref.dtype)


def layernorm_kernel_packed(w_ref, b_ref, seg_ref, x_ref, o_ref, *, eps, feat):
    """Packed path: `pack` logical rows per 128-lane physical row.

    seg is a block-diagonal 0/1 matrix (column i, column j in the same
    C-segment).  x @ seg produces the per-segment sum already broadcast across
    the segment's lanes, so all remaining ops stay elementwise / lane-local.
    """
    x = x_ref[...].astype(jnp.float32)
    seg = seg_ref[...]
    inv_c = jnp.float32(1.0 / feat)
    mean = jnp.dot(x, seg, preferred_element_type=jnp.float32,
                   precision=jax.lax.Precision.HIGHEST) * inv_c
    xc = x - mean
    var = jnp.dot(xc * xc, seg, preferred_element_type=jnp.float32,
                  precision=jax.lax.Precision.HIGHEST) * inv_c + eps
    inv = jax.lax.rsqrt(var)
    w = w_ref[...].astype(jnp.float32)
    b = b_ref[...].astype(jnp.float32)
    o_ref[...] = (xc * inv * w + b).astype(o_ref.dtype)


def layernorm_forward(x, weight, bias, *, eps=1e-5):
    """x: (..., *normalized_shape); weight/bias: normalized_shape."""
    norm_shape = weight.shape
    C = 1
    for d in norm_shape:
        C *= int(d)

    orig_shape = x.shape
    M = x.size // C

    # Lane-dense packing for small feature dims (C < 128): fold `pack` logical
    # rows into one 128-lane physical row so output stores are unmasked.
    pack = 1
    if C < 128 and 128 % C == 0 and M % (128 // C) == 0:
        pack = 128 // C
    cols = C * pack
    M_rows = M // pack

    x2 = x.reshape(M_rows, cols)                  # contiguous reshape: free
    w2 = weight.reshape(1, C)
    b2 = bias.reshape(1, C)
    if pack > 1:
        w2 = jnp.tile(w2, (1, pack))              # column j -> weight[j % C]
        b2 = jnp.tile(b2, (1, pack))

    in_bytes = jnp.dtype(x.dtype).itemsize
    out_bytes = in_bytes

    budget, vmem_limit = _vmem_budget_and_limit()
    # Double-buffering: 2 input + 2 output tiles of (tm, cols) live at once.
    per_row_bytes = 2 * (in_bytes + out_bytes) * cols
    tm = min(1024, max(8, (budget // per_row_bytes) // 8 * 8))
    # Aim for >= ~8 grid steps (pipeline overlap + both v7x TensorCores), but
    # don't shrink tiles below 256 rows just for that, and never allocate a
    # tile larger than the (rounded-up) row count.
    tm = min(tm, max(256, _round_up(pl.cdiv(M_rows, 8), 8)))
    tm = min(tm, _round_up(M_rows, 8))
    tm = max(tm, 8)

    grid_m = pl.cdiv(M_rows, tm)   # no pad/slice: partial last block is fine

    if pack > 1:
        col_id = jnp.arange(cols, dtype=jnp.int32) // C
        seg = (col_id[:, None] == col_id[None, :]).astype(jnp.float32)
        kernel = functools.partial(layernorm_kernel_packed, eps=float(eps), feat=C)
        extra_inputs = (seg,)
        extra_specs = [pl.BlockSpec((cols, cols), lambda i: (0, 0))]  # resident
    else:
        kernel = functools.partial(layernorm_kernel, eps=float(eps))
        extra_inputs = ()
        extra_specs = []

    out = pl.pallas_call(
        kernel,
        out_shape=jax.ShapeDtypeStruct((M_rows, cols), x.dtype),
        grid_spec=pltpu.PrefetchScalarGridSpec(
            num_scalar_prefetch=0,
            grid=(grid_m,),
            in_specs=[
                pl.BlockSpec((1, cols), lambda i: (0, 0)),   # weight (resident)
                pl.BlockSpec((1, cols), lambda i: (0, 0)),   # bias   (resident)
                *extra_specs,                                # seg    (resident)
                pl.BlockSpec((tm, cols), lambda i: (i, 0)),  # x tile
            ],
            out_specs=pl.BlockSpec((tm, cols), lambda i: (i, 0)),
        ),
        compiler_params=pltpu.CompilerParams(
            dimension_semantics=("parallel",),
            vmem_limit_bytes=vmem_limit,
        ),
    )(w2, b2, *extra_inputs, x2)

    return out.reshape(orig_shape)


if __name__ == "__main__":
    # Matches LayerNorm.__init__(normalized_shape=hidden):
    #   weight = ones(hidden), bias = zeros(hidden), eps = 1e-5
    batch, seq, hidden = 2, 8, 32
    eps = 1e-5
    weight = jnp.ones((hidden,), dtype=jnp.float32)
    bias = jnp.zeros((hidden,), dtype=jnp.float32)

    key = jax.random.PRNGKey(0)
    x = jax.random.normal(key, (batch, seq, hidden), dtype=jnp.float32)

    out = layernorm_forward(x, weight, bias, eps=eps)
    out = jax.block_until_ready(out)

    # Reference check (PyTorch LayerNorm semantics, unbiased=False variance).
    mean = jnp.mean(x, axis=-1, keepdims=True)
    var = jnp.mean((x - mean) ** 2, axis=-1, keepdims=True) + eps
    ref = (x - mean) * jax.lax.rsqrt(var) * weight + bias

    assert out.shape == x.shape
    assert jnp.allclose(out, ref, atol=1e-5, rtol=1e-5)

    print("KERNEL_OK")
</pallas_src>

<mosaic_0001>
module attributes {stable_mosaic.version = 11 : i64} {
  func.func @layernorm_kernel_packed(%arg0: i32, %arg1: memref<1x128xf32, #tpu.memory_space<vmem>>, %arg2: memref<1x128xf32, #tpu.memory_space<vmem>>, %arg3: memref<128x128xf32, #tpu.memory_space<vmem>>, %arg4: memref<8x128xf32, #tpu.memory_space<vmem>>, %arg5: memref<8x128xf32, #tpu.memory_space<vmem>>) attributes {dimension_semantics = [#tpu.dimension_semantics<parallel>], iteration_bounds = array<i64: 1>, scalar_prefetch = 0 : i64, scratch_operands = 0 : i64, tpu.core_type = #tpu.core_type<tc>, window_params = [{pipeline_mode = #tpu.pipeline_mode<synchronous>, transform_indices = @transform_0, window_bounds = array<i64: 1, 128>}, {pipeline_mode = #tpu.pipeline_mode<synchronous>, transform_indices = @transform_1, window_bounds = array<i64: 1, 128>}, {pipeline_mode = #tpu.pipeline_mode<synchronous>, transform_indices = @transform_2, window_bounds = array<i64: 128, 128>}, {transform_indices = @transform_3, window_bounds = array<i64: 8, 128>}, {transform_indices = @transform_4, window_bounds = array<i64: 8, 128>}]} {
    %c0 = arith.constant 0 : index
    %c0_0 = arith.constant 0 : index
    %0 = vector.load %arg4[%c0, %c0_0] : memref<8x128xf32, #tpu.memory_space<vmem>>, vector<8x128xf32>
    %c0_1 = arith.constant 0 : index
    %c0_2 = arith.constant 0 : index
    %1 = vector.load %arg3[%c0_1, %c0_2] : memref<128x128xf32, #tpu.memory_space<vmem>>, vector<128x128xf32>
    %cst = arith.constant dense<0.000000e+00> : vector<8x128xf32>
    %2 = tpu.matmul %0, %1, %cst {dimension_numbers = #tpu.dot_dimension_numbers<[1], [0], [0], [1], [0, 0, 1, 1], [], []>, precision = #tpu.contract_precision<fp32>} : vector<8x128xf32>, vector<128x128xf32>, vector<8x128xf32> -> vector<8x128xf32>
    %cst_3 = arith.constant 3.125000e-02 : f32
    %3 = vector.broadcast %cst_3 : f32 to vector<8x128xf32>
    %4 = arith.mulf %2, %3 : vector<8x128xf32>
    %5 = arith.subf %0, %4 : vector<8x128xf32>
    %6 = arith.mulf %5, %5 : vector<8x128xf32>
    %cst_4 = arith.constant dense<0.000000e+00> : vector<8x128xf32>
    %7 = tpu.matmul %6, %1, %cst_4 {dimension_numbers = #tpu.dot_dimension_numbers<[1], [0], [0], [1], [0, 0, 1, 1], [], []>, precision = #tpu.contract_precision<fp32>} : vector<8x128xf32>, vector<128x128xf32>, vector<8x128xf32> -> vector<8x128xf32>
    %cst_5 = arith.constant 3.125000e-02 : f32
    %8 = vector.broadcast %cst_5 : f32 to vector<8x128xf32>
    %9 = arith.mulf %7, %8 : vector<8x128xf32>
    %cst_6 = arith.constant 9.99999974E-6 : f32
    %10 = vector.broadcast %cst_6 : f32 to vector<8x128xf32>
    %11 = arith.addf %9, %10 : vector<8x128xf32>
    %12 = math.rsqrt %11 : vector<8x128xf32>
    %c0_7 = arith.constant 0 : index
    %c0_8 = arith.constant 0 : index
    %13 = vector.load %arg1[%c0_7, %c0_8] : memref<1x128xf32, #tpu.memory_space<vmem>>, vector<1x128xf32>
    %c0_9 = arith.constant 0 : index
    %c0_10 = arith.constant 0 : index
    %14 = vector.load %arg2[%c0_9, %c0_10] : memref<1x128xf32, #tpu.memory_space<vmem>>, vector<1x128xf32>
    %15 = arith.mulf %5, %12 : vector<8x128xf32>
    %16 = vector.broadcast %13 : vector<1x128xf32> to vector<8x128xf32>
    %17 = arith.mulf %15, %16 : vector<8x128xf32>
    %18 = vector.broadcast %14 : vector<1x128xf32> to vector<8x128xf32>
    %19 = arith.addf %17, %18 : vector<8x128xf32>
    %c0_11 = arith.constant 0 : index
    %c0_12 = arith.constant 0 : index
    %20 = vector.load %arg5[%c0_11, %c0_12] : memref<8x128xf32, #tpu.memory_space<vmem>>, vector<8x128xf32>
    tpu.vector_store %arg5[%c0_11, %c0_12], %19 {strides = array<i32>} : memref<8x128xf32, #tpu.memory_space<vmem>>, vector<8x128xf32>,
    return
  }
  func.func @transform_0(%arg0: i32) -> (i32, i32) {
    %c0_i32 = arith.constant 0 : i32
    %c0_i32_0 = arith.constant 0 : i32
    %c0_i32_1 = arith.constant 0 : i32
    return %c0_i32, %c0_i32_0 : i32, i32
  }
  func.func @transform_1(%arg0: i32) -> (i32, i32) {
    %c0_i32 = arith.constant 0 : i32
    %c0_i32_0 = arith.constant 0 : i32
    %c0_i32_1 = arith.constant 0 : i32
    return %c0_i32, %c0_i32_0 : i32, i32
  }
  func.func @transform_2(%arg0: i32) -> (i32, i32) {
    %c0_i32 = arith.constant 0 : i32
    %c0_i32_0 = arith.constant 0 : i32
    %c0_i32_1 = arith.constant 0 : i32
    return %c0_i32, %c0_i32_0 : i32, i32
  }
  func.func @transform_3(%arg0: i32) -> (i32, i32) {
    %c0_i32 = arith.constant 0 : i32
    %c0_i32_0 = arith.constant 0 : i32
    return %arg0, %c0_i32 : i32, i32
  }
  func.func @transform_4(%arg0: i32) -> (i32, i32) {
    %c0_i32 = arith.constant 0 : i32
    %c0_i32_0 = arith.constant 0 : i32
    return %arg0, %c0_i32 : i32, i32
  }
}

</mosaic_0001>

<bundles_post_ra>
// kernel: tpu_custom_call.1
= control target key start
LH: loop header
LB: loop body
LE: loop exit
PB: predicated region body
PF: predicated region fallthrough
CT: control target
= control target key end

     0   :  { %9 = vsyncpa [#allocation3], 0  ;;  %s2971_s0 = inlined_call_operand.hbm [shape: f32[1,128], index: 0, kind: input, shape index: {}]   ;;  %s2972_s1 = inlined_call_operand.hbm [shape: f32[1,128], index: 1, kind: input, shape index: {}]   ;;  %s2973_s2 = inlined_call_operand.hbm [shape: f32[128,128], index: 2, kind: input, shape index: {}]   ;;  %s2974_s3 = inlined_call_operand.hbm [shape: f32[4,128], index: 3, kind: input, shape index: {}]   ;;  %s2975_s4 = inlined_call_operand.hbm [shape: f32[4,128], index: 4, kind: output, shape index: {}]  }
   0x1   :  { %10 = vsyncpa [#allocation6], 0 }
   0x2   :  { %11 = vsyncpa [#allocation9], 0 }
   0x3   :  { %12 = vsyncpa [#allocation4], 0  ;;  %s2477_s15 = smov [#allocation5]   ;;  %s2478_s17 = smov [#allocation2]  }
   0x4   :  { %s29_s16 = sshll.u32 %s2477_s15, 4  ;;  %s19_s18 = sshll.u32 %s2478_s17, 4  ;;  %s30_s16 = int_to_ptr.vmem [resolvable:$true] %s29_s16  ;;  %s20_s18 = int_to_ptr.vmem [resolvable:$true] %s19_s18 }
   0x5   :  { %s2359_s21 = scalar_lea.hbm %s2972_s1, 16 }
   0x6   :  { %p2360_p0 = scmp.ne.s32.totalorder %s2972_s1, %s2359_s21  ;;  %p2363_p1 = scmp.lt.u32.totalorder %s2359_s21, %s2972_s1 }
   0x8   :  { %p2365_p2 = pnand %p2363_p1, %p2360_p0 }
   0xa   :  { %2368 = shalt.err (!%p2365_p2)
}
   0xb   :  { %s2369_s26 = scalar_lea.vmem %s30_s16, 16  ;;  %s2373_s27 = scalar_lea.vmem %s30_s16, 32 }
   0xc   :  { %p2370_p3 = scmp.ne.s32.totalorder %s30_s16, %s2369_s26  ;;  %p2374_p4 = scmp.lt.s32.totalorder %s30_s16, %s30_s16 }
   0xd   :  { %p2375_p5 = scmp.lt.s32.totalorder %s2373_s27, %s2369_s26 }
   0xf   :  { %p2376_p6 = por %p2375_p5, %p2374_p4 }
  0x11   :  { %p2377_p7 = pnand %p2376_p6, %p2370_p3 }
  0x13   :  { %2380 = shalt.err (!%p2377_p7)
}
  0x14   :  { %32 = dma.hbm_to_vmem [thread:$0]  %s2972_s1, 16, %s30_s16, [#allocation6]  }
  0x15   :  { %s2381_s6 = scalar_lea.hbm %s2971_s0, 16 }
  0x16   :  { %p2382_p8 = scmp.ne.s32.totalorder %s2971_s0, %s2381_s6  ;;  %p2385_p9 = scmp.lt.u32.totalorder %s2381_s6, %s2971_s0 }
  0x18   :  { %p2387_p10 = pnand %p2385_p9, %p2382_p8 }
  0x1a   :  { %2390 = shalt.err (!%p2387_p10)
}
  0x1b   :  { %s2391_s11 = scalar_lea.vmem %s20_s18, 16  ;;  %s2395_s12 = scalar_lea.vmem %s20_s18, 32 }
  0x1c   :  { %p2392_p11 = scmp.ne.s32.totalorder %s20_s18, %s2391_s11  ;;  %p2396_p12 = scmp.lt.s32.totalorder %s20_s18, %s20_s18 }
  0x1d   :  { %p2397_p13 = scmp.lt.s32.totalorder %s2395_s12, %s2391_s11 }
  0x1f   :  { %p2398_p0 = por %p2397_p13, %p2396_p12 }
  0x21   :  { %p2399_p1 = pnand %p2398_p0, %p2392_p11 }
  0x23   :  { %2402 = shalt.err (!%p2399_p1)
}
  0x24   :  { %22 = dma.hbm_to_vmem [thread:$0]  %s2971_s0, 16, %s20_s18, [#allocation3]  }
  0x25   :  { %s2479_s14 = smov [#allocation7]   ;;  %s2403_s19 = scalar_lea.hbm %s2973_s2, 2048 }
  0x26   :  { %s38_s15 = sshll.u32 %s2479_s14, 4  ;;  %p2404_p2 = scmp.ne.s32.totalorder %s2973_s2, %s2403_s19  ;;  %s39_s15 = int_to_ptr.vmem [resolvable:$true] %s38_s15 }
  0x27   :  { %p2407_p3 = scmp.lt.u32.totalorder %s2403_s19, %s2973_s2 }
  0x29   :  { %p2409_p4 = pnand %p2407_p3, %p2404_p2 }
  0x2b   :  { %2412 = shalt.err (!%p2409_p4)
}
  0x2c   :  { %s2413_s24 = scalar_lea.vmem %s39_s15, 2048  ;;  %p2418_p6 = scmp.lt.s32.totalorder %s39_s15, %s39_s15 }
  0x2d   :  { %p2414_p5 = scmp.ne.s32.totalorder %s39_s15, %s2413_s24  ;;  %p2419_p7 = scmp.lt.s32.totalorder %s2413_s24, %s2413_s24 }
  0x2f   :  { %p2420_p8 = por %p2419_p7, %p2418_p6 }
  0x31   :  { %p2421_p9 = pnand %p2420_p8, %p2414_p5 }
  0x33   :  { %2424 = shalt.err (!%p2421_p9)
}
  0x34   :  { %s2480_s0 = smov 128   ;;  %s2481_s18 = smov 8  }
  0x35   :  { %44 = dma.hbm_to_vmem [thread:$0]  %s2973_s2, 2048, %s39_s15, [#allocation6], %s2480_s0, %s2480_s0, %s2481_s18  }
  0x36   :  { %49 = vsyncadd [#allocation9], 64  ;;  %s2482_s27 = smov [#allocation8]   ;;  %s2425_s5 = scalar_lea.hbm %s2974_s3, 64 }
  0x37   :  { %s50_s28 = sshll.u32 %s2482_s27, 4  ;;  %p2426_p10 = scmp.ne.s32.totalorder %s2974_s3, %s2425_s5  ;;  %s51_s28 = int_to_ptr.vmem [resolvable:$true] %s50_s28 }
  0x38   :  { %p2429_p11 = scmp.lt.u32.totalorder %s2425_s5, %s2974_s3 }
  0x3a   :  { %p2431_p12 = pnand %p2429_p11, %p2426_p10 }
  0x3c   :  { %2434 = shalt.err (!%p2431_p12)
}
  0x3d   :  { %s2435_s10 = scalar_lea.vmem %s51_s28, 64  ;;  %s2439_s2 = scalar_lea.vmem %s51_s28, 128 }
  0x3e   :  { %p2436_p13 = scmp.ne.s32.totalorder %s51_s28, %s2435_s10  ;;  %p2440_p0 = scmp.lt.s32.totalorder %s51_s28, %s51_s28 }
  0x3f   :  { %p2441_p1 = scmp.lt.s32.totalorder %s2439_s2, %s2435_s10 }
  0x41   :  { %p2442_p2 = por %p2441_p1, %p2440_p0 }
  0x43   :  { %p2443_p3 = pnand %p2442_p2, %p2436_p13 }
  0x45   :  { %2446 = shalt.err (!%p2443_p3)
}
  0x46   :  { %s2483_s11 = smov 64   ;;  %s2484_s12 = smov 4  }
  0x47   :  { %56 = dma.hbm_to_vmem [thread:$0]  %s2974_s3, 64, %s51_s28, [#allocation9], %s2483_s11, %s2483_s11, %s2484_s12  }
  0x48   :  { %2469 = dma.done.wait [#allocation3], 16  }
  0x49   :  { %2470 = vsyncadd [#allocation3], 4294967280 }
  0x4a   :  { %2471 = dma.done.wait [#allocation6], 2064  }
  0x4b   :  { %2472 = vsyncadd [#allocation6], 4294965232 }
  0x4c   :  { %2473 = dma.done.wait [#allocation9], 128  }
  0x4d   :  { %2474 = vsyncadd [#allocation9], 4294967168  ;;  %v2485_v0 = vmov 0.0|0.0   ;;  %vm2486_vm0 = vmmov 0   ;;  %v2487_v1 = vmov 0.0   ;;  %v70_v2 = vld [vmem:[#allocation7] sm:$0xff] }
  0x4e   :  { %2037 = vmatprep.subr.bf16.mxu0 %v2485_v0  ;;  %1649 = vmatprep.mubr.msk.f32.mxu0 %vm2486_vm0, %v2487_v1  ;;  %v71_v3 = vld [vmem:[#allocation7 + $0x8] sm:$0xff]  ;;  %v72_v4 = vld [vmem:[#allocation7 + $0x10] sm:$0xff]  ;;  %v87_v5 = vand.u32 4294901760, %v70_v2  ;;  %v73_v7 = vld [vmem:[#allocation7 + $0x18] sm:$0xff] }
  0x4f   :  { %2181 = vmatprep.subr.bf16.mxu1 %v2485_v0  ;;  %1859 = vmatprep.mubr.msk.f32.mxu1 %vm2486_vm0, %v2487_v1  ;;  %v90_v6 = vand.u32 4294901760, %v71_v3  ;;  %v93_v8 = vand.u32 4294901760, %v72_v4  ;;  %v96_v9 = vand.u32 4294901760, %v73_v7  ;;  %v74_v10 = vld [vmem:[#allocation7 + $0x20] sm:$0xff]  ;;  %v75_v11 = vld [vmem:[#allocation7 + $0x28] sm:$0xff]  ;;  %v76_v16 = vld [vmem:[#allocation7 + $0x30] sm:$0xff] }
  0x50   :  { %v99_v14 = vand.u32 4294901760, %v74_v10  ;;  %v102_v15 = vand.u32 4294901760, %v75_v11  ;;  %v77_v17 = vld [vmem:[#allocation7 + $0x38] sm:$0xff]  ;;  %v105_v19 = vand.u32 4294901760, %v76_v16  ;;  %v78_v21 = vld [vmem:[#allocation7 + $0x40] sm:$0xff]  ;;  %v79_v23 = vld [vmem:[#allocation7 + $0x48] sm:$0xff]  ;;  %v2593_v34 = vsub.f32 %v70_v2, %v87_v5 }
  0x51   :  { %v2571_v12 = vpack.c.bf16 %v90_v6, %v87_v5  ;;  %v2574_v13 = vpack.c.bf16 %v96_v9, %v93_v8  ;;  %v108_v20 = vand.u32 4294901760, %v77_v17  ;;  %v2582_v22 = vld [vmem:[#allocation8] sm:$0xff]  ;;  %v80_v24 = vld [vmem:[#allocation7 + $0x50] sm:$0xff]  ;;  %v81_v25 = vld [vmem:[#allocation7 + $0x58] sm:$0xff]  ;;  %v111_v27 = vand.u32 4294901760, %v78_v21 }
  0x52   :  { %v2580_v18 = vpack.c.bf16 %v102_v15, %v99_v14  ;;  %v82_v26 = vld [vmem:[#allocation7 + $0x60] sm:$0xff]  ;;  %v83_v28 = vld [vmem:[#allocation7 + $0x68] sm:$0xff]  ;;  %v84_v29 = vld [vmem:[#allocation7 + $0x70] sm:$0xff]  ;;  %v2588_v31 = vand.u32 4294901760, %v2582_v22  ;;  %v114_v33 = vand.u32 4294901760, %v79_v23  ;;  %v2595_v35 = vsub.f32 %v71_v3, %v90_v6 }
  0x53   :  { %2039 = vmatpush3.bf16.msra.mxu0 %v2571_v12  ;;  %2183 = vmatpush3.bf16.msra.mxu1 %v2571_v12  ;;  %v85_v30 = vld [vmem:[#allocation7 + $0x78] sm:$0xff]  ;;  %v2591_v32 = vpack.c.bf16 %v108_v20, %v105_v19  ;;  %v117_v36 = vand.u32 4294901760, %v80_v24  ;;  %v120_v37 = vand.u32 4294901760, %v81_v25  ;;  %v123_v38 = vand.u32 4294901760, %v82_v26 }
  0x54   :  { %2040 = vmatprep.subr.bf16.mxu0 %v2485_v0  ;;  %2184 = vmatprep.subr.bf16.mxu1 %v2485_v0  ;;  %v126_v39 = vand.u32 4294901760, %v83_v28  ;;  %v129_v40 = vand.u32 4294901760, %v84_v29  ;;  %v132_v41 = vand.u32 4294901760, %v85_v30  ;;  %v2602_v42 = vsub.f32 %v2582_v22, %v2588_v31 }
  0x55   :  { %v2604_v43 = vsub.f32 %v72_v4, %v93_v8  ;;  %v2607_v44 = vpack.c.bf16 %v114_v33, %v111_v27  ;;  %v180_v45 = vand.u32 4294901760, %v2593_v34  ;;  %v187_v46 = vand.u32 4294901760, %v2595_v35 }
  0x56   :  { %v2611_v47 = vsub.f32 %v73_v7, %v96_v9  ;;  %v2615_v48 = vsub.f32 %v74_v10, %v99_v14  ;;  %v2618_v49 = vpack.c.bf16 %v120_v37, %v117_v36  ;;  %v2620_v50 = vpack.c.bf16 %v126_v39, %v123_v38 }
  0x57   :  { %2042 = vmatpush3.bf16.msra.mxu0 %v2574_v13  ;;  %2186 = vmatpush3.bf16.msra.mxu1 %v2574_v13  ;;  %v2622_v51 = vpack.c.bf16 %v132_v41, %v129_v40  ;;  %v169_v52 = vand.u32 4294901760, %v2602_v42  ;;  %v194_v53 = vand.u32 4294901760, %v2604_v43  ;;  %v2626_v54 = vsub.f32 %v75_v11, %v102_v15 }
  0x58   :  { %2043 = vmatprep.subr.bf16.mxu0 %v2485_v0  ;;  %2187 = vmatprep.subr.bf16.mxu1 %v2485_v0  ;;  %v2628_v55 = vsub.f32 %v76_v16, %v105_v19  ;;  %v181_v56 = vsub.f32 %v2593_v34, %v180_v45  ;;  %v188_v57 = vsub.f32 %v2595_v35, %v187_v46  ;;  %v201_v58 = vand.u32 4294901760, %v2611_v47 }
  0x59   :  { %v2634_v59 = vsub.f32 %v77_v17, %v108_v20  ;;  %v208_v60 = vand.u32 4294901760, %v2615_v48  ;;  %v2639_v61 = vsub.f32 %v78_v21, %v111_v27  ;;  %v2641_v62 = vsub.f32 %v79_v23, %v114_v33 }
  0x5a   :  { %v2643_v63 = vsub.f32 %v80_v24, %v117_v36  ;;  %v2646_v2 = vsub.f32 %v81_v25, %v120_v37  ;;  %v2648_v3 = vsub.f32 %v82_v26, %v123_v38  ;;  %v2650_v4 = vsub.f32 %v83_v28, %v126_v39 }
  0x5b   :  { %2045 = vmatpush3.bf16.msra.mxu0 %v2580_v18  ;;  %2189 = vmatpush3.bf16.msra.mxu1 %v2580_v18  ;;  %v2652_v5 = vsub.f32 %v84_v29, %v129_v40  ;;  %v170_v6 = vsub.f32 %v2602_v42, %v169_v52  ;;  %v195_v7 = vsub.f32 %v2604_v43, %v194_v53  ;;  %v215_v8 = vand.u32 4294901760, %v2626_v54 }
  0x5c   :  { %2046 = vmatprep.subr.bf16.mxu0 %v2485_v0  ;;  %2190 = vmatprep.subr.bf16.mxu1 %v2485_v0  ;;  %v2659_v9 = vsub.f32 %v85_v30, %v132_v41  ;;  %v182_v10 = vand.u32 4294901760, %v181_v56  ;;  %v189_v11 = vand.u32 4294901760, %v188_v57  ;;  %v202_v14 = vsub.f32 %v2611_v47, %v201_v58 }
  0x5d   :  { %v222_v15 = vand.u32 4294901760, %v2628_v55  ;;  %v229_v16 = vand.u32 4294901760, %v2634_v59  ;;  %v236_v17 = vand.u32 4294901760, %v2639_v61  ;;  %v243_v19 = vand.u32 4294901760, %v2641_v62 }
  0x5e   :  { %v250_v20 = vand.u32 4294901760, %v2643_v63  ;;  %v257_v21 = vand.u32 4294901760, %v2646_v2  ;;  %v264_v23 = vand.u32 4294901760, %v2648_v3  ;;  %v271_v24 = vand.u32 4294901760, %v2650_v4 }
  0x5f   :  { %2048 = vmatpush3.bf16.msra.mxu0 %v2591_v32  ;;  %2192 = vmatpush3.bf16.msra.mxu1 %v2591_v32  ;;  %v278_v25 = vand.u32 4294901760, %v2652_v5  ;;  %v285_v26 = vand.u32 4294901760, %v2659_v9  ;;  %v2676_v27 = vpack.c.bf16 %v187_v46, %v180_v45  ;;  %v2678_v28 = vpack.c.bf16 %v201_v58, %v194_v53 }
  0x60   :  { %2049 = vmatprep.subr.bf16.mxu0 %v2485_v0  ;;  %2193 = vmatprep.subr.bf16.mxu1 %v2485_v0  ;;  %v2680_v29 = vpack.c.bf16 %v215_v8, %v208_v60  ;;  %v2683_v30 = vpack.c.bf16 %v229_v16, %v222_v15  ;;  %v2685_v33 = vpack.c.bf16 %v243_v19, %v236_v17  ;;  %v171_v39 = vand.u32 4294901760, %v170_v6 }
  0x61   :  { %v2687_v36 = vpack.c.bf16 %v257_v21, %v250_v20  ;;  %v2689_v37 = vpack.c.bf16 %v271_v24, %v264_v23  ;;  %v2692_v38 = vpack.c.bf16 %v285_v26, %v278_v25  ;;  %v209_v40 = vsub.f32 %v2615_v48, %v208_v60 }
  0x62   :  { %v2698_v41 = vpack.c.bf16 %v189_v11, %v182_v10  ;;  %v196_v45 = vand.u32 4294901760, %v195_v7  ;;  %v203_v46 = vand.u32 4294901760, %v202_v14  ;;  %v216_v53 = vsub.f32 %v2626_v54, %v215_v8 }
  0x63   :  { %2051 = vmatpush3.bf16.msra.mxu0 %v2607_v44  ;;  %2195 = vmatpush3.bf16.msra.mxu1 %v2607_v44  ;;  %v223_v56 = vsub.f32 %v2628_v55, %v222_v15  ;;  %v210_v58 = vand.u32 4294901760, %v209_v40  ;;  %v230_v6 = vsub.f32 %v2634_v59, %v229_v16  ;;  %v237_v11 = vsub.f32 %v2639_v61, %v236_v17 }
  0x64   :  { %2052 = vmatprep.subr.bf16.mxu0 %v2485_v0  ;;  %2196 = vmatprep.subr.bf16.mxu1 %v2485_v0  ;;  %v2706_v57 = vpack.c.bf16 %v203_v46, %v196_v45  ;;  %v217_v60 = vand.u32 4294901760, %v216_v53  ;;  %v244_v14 = vsub.f32 %v2641_v62, %v243_v19  ;;  %v251_v15 = vsub.f32 %v2643_v63, %v250_v20 }
  0x65   :  { %v224_v7 = vand.u32 4294901760, %v223_v56  ;;  %v231_v10 = vand.u32 4294901760, %v230_v6  ;;  %v258_v45 = vsub.f32 %v2646_v2, %v257_v21  ;;  %v265_v46 = vsub.f32 %v2648_v3, %v264_v23 }
  0x66   :  { %v2713_v8 = vpack.c.bf16 %v217_v60, %v210_v58  ;;  %v245_v40 = vand.u32 4294901760, %v244_v14  ;;  %v252_v19 = vand.u32 4294901760, %v251_v15  ;;  %v272_v20 = vsub.f32 %v2650_v4, %v271_v24 }
  0x67   :  { %2054 = vmatpush3.bf16.msra.mxu0 %v2618_v49  ;;  %2198 = vmatpush3.bf16.msra.mxu1 %v2618_v49  ;;  %v2720_v16 = vpack.c.bf16 %v231_v10, %v224_v7  ;;  %v259_v53 = vand.u32 4294901760, %v258_v45  ;;  %v279_v56 = vsub.f32 %v2652_v5, %v278_v25  ;;  %v266_v21 = vand.u32 4294901760, %v265_v46 }
  0x68   :  { %2055 = vmatprep.subr.bf16.mxu0 %v2485_v0  ;;  %2199 = vmatprep.subr.bf16.mxu1 %v2485_v0  ;;  %v273_v60 = vand.u32 4294901760, %v272_v20  ;;  %v286_v23 = vsub.f32 %v2659_v9, %v285_v26  ;;  %v2747_v26 = vpack.c.bf16 %v2595_v35, %v2593_v34  ;;  %v2754_v10 = vpack.c.bf16 %v2611_v47, %v2604_v43 }
  0x69   :  { %v2732_v58 = vpack.c.bf16 %v259_v53, %v252_v19  ;;  %v280_v7 = vand.u32 4294901760, %v279_v56  ;;  %v2762_v34 = vpack.c.bf16 %v2626_v54, %v2615_v48  ;;  %v2768_v35 = vpack.c.bf16 %v2634_v59, %v2628_v55 }
  0x6a   :  { %v2737_v6 = vpack.c.bf16 %v273_v60, %v266_v21  ;;  %v287_v24 = vand.u32 4294901760, %v286_v23  ;;  %v2774_v43 = vpack.c.bf16 %v2641_v62, %v2639_v61  ;;  %v2780_v47 = vpack.c.bf16 %v2646_v2, %v2643_v63 }
  0x6b   :  { %2057 = vmatpush3.bf16.msra.mxu0 %v2620_v50  ;;  %2201 = vmatpush3.bf16.msra.mxu1 %v2620_v50  ;;  %v2786_v48 = vpack.c.bf16 %v2650_v4, %v2648_v3  ;;  %v2792_v54 = vpack.c.bf16 %v2659_v9, %v2652_v5 }
  0x6c   :  { %2058 = vmatprep.subr.bf16.mxu0 %v2485_v0  ;;  %2202 = vmatprep.subr.bf16.mxu1 %v2485_v0  ;;  %v2741_v25 = vpack.c.bf16 %v287_v24, %v280_v7 }
  0x6f   :  { %2060 = vmatpush3.bf16.msra.mxu0 %v2622_v51  ;;  %2204 = vmatpush3.bf16.msra.mxu1 %v2622_v51 }
  0x70   :  { %2061 = vmatprep.subr.bf16.mxu0 %v2485_v0  ;;  %2205 = vmatprep.subr.bf16.mxu1 %v2485_v0 }
  0x72   :  { %1650 = vmatmul.mubr.f32.vlgmr.msra.gmra.mrb[0].mxu0 %v171_v39  ;;  %v238_v39 = vand.u32 4294901760, %v237_v11 }
  0x73   :  { %2063 = vmatpush3.bf16.msra.mxu0 %v2698_v41  ;;  %1684 = vmatprep.mubr.msk.f32.mxu0 %vm2486_vm0, %v2487_v1 }
  0x74   :  { %2064 = vmatprep.subr.bf16.mxu0 %v2485_v0  ;;  %v2726_v17 = vpack.c.bf16 %v245_v40, %v238_v39 }
  0x77   :  { %2066 = vmatpush3.bf16.msra.mxu0 %v2706_v57 }
  0x78   :  { %2067 = vmatprep.subr.bf16.mxu0 %v2485_v0 }
  0x7b   :  { %2069 = vmatpush3.bf16.msra.mxu0 %v2713_v8 }
  0x7c   :  { %2070 = vmatprep.subr.bf16.mxu0 %v2485_v0 }
  0x7f   :  { %2072 = vmatpush3.bf16.msra.mxu0 %v2720_v16 }
  0x80   :  { %2073 = vmatprep.subr.bf16.mxu0 %v2485_v0 }
  0x83   :  { %2075 = vmatpush3.bf16.msra.mxu0 %v2726_v17 }
  0x84   :  { %2076 = vmatprep.subr.bf16.mxu0 %v2485_v0 }
  0x87   :  { %2078 = vmatpush3.bf16.msra.mxu0 %v2732_v58 }
  0x88   :  { %2079 = vmatprep.subr.bf16.mxu0 %v2485_v0 }
  0x8b   :  { %2081 = vmatpush3.bf16.msra.mxu0 %v2737_v6 }
  0x8c   :  { %2082 = vmatprep.subr.bf16.mxu0 %v2485_v0 }
  0x8f   :  { %2084 = vmatpush3.bf16.msra.mxu0 %v2741_v25 }
  0x90   :  { %2085 = vmatprep.subr.bf16.mxu0 %v2485_v0 }
  0x92   :  { %1685 = vmatmul.mubr.f32.vlgmr.msra.gmra.mrb[0].mxu0 %v2588_v31 }
  0x93   :  { %2087 = vmatpush3.bf16.msra.mxu0 %v2747_v26  ;;  %1719 = vmatprep.mubr.msk.f32.mxu0 %vm2486_vm0, %v2487_v1 }
  0x94   :  { %2088 = vmatprep.subr.bf16.mxu0 %v2485_v0 }
  0x97   :  { %2090 = vmatpush3.bf16.msra.mxu0 %v2754_v10 }
  0x98   :  { %2091 = vmatprep.subr.bf16.mxu0 %v2485_v0 }
  0x9b   :  { %2093 = vmatpush3.bf16.msra.mxu0 %v2762_v34 }
  0x9c   :  { %2094 = vmatprep.subr.bf16.mxu0 %v2485_v0 }
  0x9f   :  { %2096 = vmatpush3.bf16.msra.mxu0 %v2768_v35 }
  0xa0   :  { %2097 = vmatprep.subr.bf16.mxu0 %v2485_v0 }
  0xa3   :  { %2099 = vmatpush3.bf16.msra.mxu0 %v2774_v43 }
  0xa4   :  { %2100 = vmatprep.subr.bf16.mxu0 %v2485_v0 }
  0xa7   :  { %2102 = vmatpush3.bf16.msra.mxu0 %v2780_v47 }
  0xa8   :  { %2103 = vmatprep.subr.bf16.mxu0 %v2485_v0 }
  0xab   :  { %2105 = vmatpush3.bf16.msra.mxu0 %v2786_v48 }
  0xac   :  { %2106 = vmatprep.subr.bf16.mxu0 %v2485_v0 }
  0xaf   :  { %2108 = vmatpush3.bf16.msra.mxu0 %v2792_v54 }
  0xb0   :  { %2109 = vmatprep.subr.bf16.mxu0 %v2485_v0 }
  0xb2   :  { %1720 = vmatmul.mubr.f32.vlgmr.msra.gmra.mrb[0].mxu0 %v2602_v42 }
  0xb3   :  { %2111 = vmatpush3.bf16.msra.mxu0 %v2571_v12  ;;  %1754 = vmatprep.mubr.msk.f32.mxu0 %vm2486_vm0, %v2487_v1 }
  0xb4   :  { %2112 = vmatprep.subr.bf16.mxu0 %v2485_v0 }
  0xb7   :  { %2114 = vmatpush3.bf16.msra.mxu0 %v2574_v13 }
  0xb8   :  { %2115 = vmatprep.subr.bf16.mxu0 %v2485_v0 }
  0xbb   :  { %2117 = vmatpush3.bf16.msra.mxu0 %v2580_v18 }
  0xbc   :  { %2118 = vmatprep.subr.bf16.mxu0 %v2485_v0 }
  0xbf   :  { %2120 = vmatpush3.bf16.msra.mxu0 %v2591_v32 }
  0xc0   :  { %2121 = vmatprep.subr.bf16.mxu0 %v2485_v0 }
  0xc3   :  { %2123 = vmatpush3.bf16.msra.mxu0 %v2607_v44 }
  0xc4   :  { %2124 = vmatprep.subr.bf16.mxu0 %v2485_v0 }
  0xc7   :  { %2126 = vmatpush3.bf16.msra.mxu0 %v2618_v49 }
  0xc8   :  { %2127 = vmatprep.subr.bf16.mxu0 %v2485_v0 }
  0xcb   :  { %2129 = vmatpush3.bf16.msra.mxu0 %v2620_v50 }
  0xcc   :  { %2130 = vmatprep.subr.bf16.mxu0 %v2485_v0 }
  0xcf   :  { %2132 = vmatpush3.bf16.msra.mxu0 %v2622_v51 }
  0xd0   :  { %2133 = vmatprep.subr.bf16.mxu0 %v2485_v0 }
  0xd2   :  { %1755 = vmatmul.mubr.f32.vlgmr.msra.gmra.mrb[0].mxu0 %v169_v52 }
  0xd3   :  { %2135 = vmatpush3.bf16.msra.mxu0 %v2676_v27  ;;  %1789 = vmatprep.mubr.msk.f32.mxu0 %vm2486_vm0, %v2487_v1 }
  0xd4   :  { %2136 = vmatprep.subr.bf16.mxu0 %v2485_v0 }
  0xd7   :  { %2138 = vmatpush3.bf16.msra.mxu0 %v2678_v28 }
  0xd8   :  { %2139 = vmatprep.subr.bf16.mxu0 %v2485_v0 }
  0xdb   :  { %2141 = vmatpush3.bf16.msra.mxu0 %v2680_v29 }
  0xdc   :  { %2142 = vmatprep.subr.bf16.mxu0 %v2485_v0 }
  0xdf   :  { %2144 = vmatpush3.bf16.msra.mxu0 %v2683_v30 }
  0xe0   :  { %2145 = vmatprep.subr.bf16.mxu0 %v2485_v0 }
  0xe3   :  { %2147 = vmatpush3.bf16.msra.mxu0 %v2685_v33 }
  0xe4   :  { %2148 = vmatprep.subr.bf16.mxu0 %v2485_v0 }
  0xe7   :  { %2150 = vmatpush3.bf16.msra.mxu0 %v2687_v36 }
  0xe8   :  { %2151 = vmatprep.subr.bf16.mxu0 %v2485_v0 }
  0xeb   :  { %2153 = vmatpush3.bf16.msra.mxu0 %v2689_v37 }
  0xec   :  { %2154 = vmatprep.subr.bf16.mxu0 %v2485_v0 }
  0xef   :  { %2156 = vmatpush3.bf16.msra.mxu0 %v2692_v38 }
  0xf0   :  { %2157 = vmatprep.subr.bf16.mxu0 %v2485_v0 }
  0xf2   :  { %1790 = vmatmul.mubr.f32.vlgmr.msra.gmra.mrb[0].mxu0 %v2588_v31 }
  0xf3   :  { %2159 = vmatpush3.bf16.msra.mxu0 %v2571_v12  ;;  %1824 = vmatprep.mubr.msk.f32.mxu0 %vm2486_vm0, %v2487_v1 }
  0xf4   :  { %2160 = vmatprep.subr.bf16.mxu0 %v2485_v0 }
  0xf7   :  { %2162 = vmatpush3.bf16.msra.mxu0 %v2574_v13 }
  0xf8   :  { %2163 = vmatprep.subr.bf16.mxu0 %v2485_v0 }
  0xfb   :  { %2165 = vmatpush3.bf16.msra.mxu0 %v2580_v18 }
  0xfc   :  { %2166 = vmatprep.subr.bf16.mxu0 %v2485_v0 }
  0xff   :  { %2168 = vmatpush3.bf16.msra.mxu0 %v2591_v32 }
 0x100   :  { %2169 = vmatprep.subr.bf16.mxu0 %v2485_v0 }
 0x103   :  { %2171 = vmatpush3.bf16.msra.mxu0 %v2607_v44 }
 0x104   :  { %2172 = vmatprep.subr.bf16.mxu0 %v2485_v0 }
 0x107   :  { %2174 = vmatpush3.bf16.msra.mxu0 %v2618_v49 }
 0x108   :  { %2175 = vmatprep.subr.bf16.mxu0 %v2485_v0 }
 0x10b   :  { %2177 = vmatpush3.bf16.msra.mxu0 %v2620_v50 }
 0x10c   :  { %2178 = vmatprep.subr.bf16.mxu0 %v2485_v0 }
 0x10f   :  { %2180 = vmatpush3.bf16.msra.mxu0 %v2622_v51 }
 0x112   :  { %1825 = vmatmul.mubr.f32.vlgmr.msra.gmra.mrb[0].mxu0 %v2588_v31  ;;  %v1411_v31 = vld [vmem:[#allocation2] ss:$0 sm:$0xff] }
 0x1e5   :  { %v723_v42 = vpop.f32.mrb[0].mxu0 }
 0x1e6   :  { %v727_v52 = vmul.f32 0.03125, %v723_v42  ;;  %v1826_v55 = vpop.f32.mrb[1].mxu0 }
 0x1e8   :  { %v2856_v59 = vsub.f32 %v2582_v22, %v727_v52 }
 0x1ea   :  { %v729_v61 = vmul.f32 %v2856_v59, %v2856_v59 }
 0x1ec   :  { %v2860_v62 = vand.u32 4294901760, %v729_v61 }
 0x1ee   :  { %v812_v63 = vsub.f32 %v729_v61, %v2860_v62 }
 0x1f0   :  { %v813_v2 = vand.u32 4294901760, %v812_v63 }
 0x1f2   :  { %v814_v3 = vsub.f32 %v812_v63, %v813_v2 }
 0x1f4   :  { %v815_v4 = vand.u32 4294901760, %v814_v3 }
 0x1f6   :  { %1860 = vmatmul.mubr.f32.vlgmr.msra.gmra.mrb[0].mxu1 %v815_v4 }
 0x1f7   :  { %2207 = vmatpush3.bf16.msra.mxu1 %v2698_v41  ;;  %1894 = vmatprep.mubr.msk.f32.mxu1 %vm2486_vm0, %v2487_v1 }
 0x1f8   :  { %2208 = vmatprep.subr.bf16.mxu1 %v2485_v0 }
 0x1fb   :  { %2210 = vmatpush3.bf16.msra.mxu1 %v2706_v57 }
 0x1fc   :  { %2211 = vmatprep.subr.bf16.mxu1 %v2485_v0 }
 0x1ff   :  { %2213 = vmatpush3.bf16.msra.mxu1 %v2713_v8 }
 0x200   :  { %2214 = vmatprep.subr.bf16.mxu1 %v2485_v0 }
 0x203   :  { %2216 = vmatpush3.bf16.msra.mxu1 %v2720_v16 }
 0x204   :  { %2217 = vmatprep.subr.bf16.mxu1 %v2485_v0 }
 0x207   :  { %2219 = vmatpush3.bf16.msra.mxu1 %v2726_v17 }
 0x208   :  { %2220 = vmatprep.subr.bf16.mxu1 %v2485_v0 }
 0x20b   :  { %2222 = vmatpush3.bf16.msra.mxu1 %v2732_v58 }
 0x20c   :  { %2223 = vmatprep.subr.bf16.mxu1 %v2485_v0 }
 0x20f   :  { %2225 = vmatpush3.bf16.msra.mxu1 %v2737_v6 }
 0x210   :  { %2226 = vmatprep.subr.bf16.mxu1 %v2485_v0 }
 0x213   :  { %2228 = vmatpush3.bf16.msra.mxu1 %v2741_v25 }
 0x214   :  { %2229 = vmatprep.subr.bf16.mxu1 %v2485_v0 }
 0x216   :  { %1895 = vmatmul.mubr.f32.vlgmr.msra.gmra.mrb[0].mxu1 %v2860_v62 }
 0x217   :  { %2231 = vmatpush3.bf16.msra.mxu1 %v2747_v26  ;;  %1929 = vmatprep.mubr.msk.f32.mxu1 %vm2486_vm0, %v2487_v1 }
 0x218   :  { %2232 = vmatprep.subr.bf16.mxu1 %v2485_v0 }
 0x21b   :  { %2234 = vmatpush3.bf16.msra.mxu1 %v2754_v10 }
 0x21c   :  { %2235 = vmatprep.subr.bf16.mxu1 %v2485_v0 }
 0x21f   :  { %2237 = vmatpush3.bf16.msra.mxu1 %v2762_v34 }
 0x220   :  { %2238 = vmatprep.subr.bf16.mxu1 %v2485_v0 }
 0x223   :  { %2240 = vmatpush3.bf16.msra.mxu1 %v2768_v35 }
 0x224   :  { %2241 = vmatprep.subr.bf16.mxu1 %v2485_v0 }
 0x227   :  { %2243 = vmatpush3.bf16.msra.mxu1 %v2774_v43 }
 0x228   :  { %2244 = vmatprep.subr.bf16.mxu1 %v2485_v0 }
 0x22b   :  { %2246 = vmatpush3.bf16.msra.mxu1 %v2780_v47 }
 0x22c   :  { %2247 = vmatprep.subr.bf16.mxu1 %v2485_v0 }
 0x22f   :  { %2249 = vmatpush3.bf16.msra.mxu1 %v2786_v48 }
 0x230   :  { %2250 = vmatprep.subr.bf16.mxu1 %v2485_v0 }
 0x233   :  { %2252 = vmatpush3.bf16.msra.mxu1 %v2792_v54 }
 0x234   :  { %2253 = vmatprep.subr.bf16.mxu1 %v2485_v0 }
 0x236   :  { %1930 = vmatmul.mubr.f32.vlgmr.msra.gmra.mrb[0].mxu1 %v812_v63 }
 0x237   :  { %2255 = vmatpush3.bf16.msra.mxu1 %v2571_v12  ;;  %1964 = vmatprep.mubr.msk.f32.mxu1 %vm2486_vm0, %v2487_v1 }
 0x238   :  { %2256 = vmatprep.subr.bf16.mxu1 %v2485_v0 }
 0x23b   :  { %2258 = vmatpush3.bf16.msra.mxu1 %v2574_v13 }
 0x23c   :  { %2259 = vmatprep.subr.bf16.mxu1 %v2485_v0 }
 0x23f   :  { %2261 = vmatpush3.bf16.msra.mxu1 %v2580_v18 }
 0x240   :  { %2262 = vmatprep.subr.bf16.mxu1 %v2485_v0 }
 0x243   :  { %2264 = vmatpush3.bf16.msra.mxu1 %v2591_v32 }
 0x244   :  { %2265 = vmatprep.subr.bf16.mxu1 %v2485_v0 }
 0x247   :  { %2267 = vmatpush3.bf16.msra.mxu1 %v2607_v44 }
 0x248   :  { %2268 = vmatprep.subr.bf16.mxu1 %v2485_v0 }
 0x24b   :  { %2270 = vmatpush3.bf16.msra.mxu1 %v2618_v49 }
 0x24c   :  { %2271 = vmatprep.subr.bf16.mxu1 %v2485_v0 }
 0x24f   :  { %2273 = vmatpush3.bf16.msra.mxu1 %v2620_v50 }
 0x250   :  { %2274 = vmatprep.subr.bf16.mxu1 %v2485_v0 }
 0x253   :  { %2276 = vmatpush3.bf16.msra.mxu1 %v2622_v51 }
 0x254   :  { %2277 = vmatprep.subr.bf16.mxu1 %v2485_v0 }
 0x256   :  { %1965 = vmatmul.mubr.f32.vlgmr.msra.gmra.mrb[0].mxu1 %v813_v2 }
 0x257   :  { %2279 = vmatpush3.bf16.msra.mxu1 %v2676_v27  ;;  %1999 = vmatprep.mubr.msk.f32.mxu1 %vm2486_vm0, %v2487_v1 }
 0x258   :  { %2280 = vmatprep.subr.bf16.mxu1 %v2485_v0 }
 0x25b   :  { %2282 = vmatpush3.bf16.msra.mxu1 %v2678_v28 }
 0x25c   :  { %2283 = vmatprep.subr.bf16.mxu1 %v2485_v0 }
 0x25f   :  { %2285 = vmatpush3.bf16.msra.mxu1 %v2680_v29 }
 0x260   :  { %2286 = vmatprep.subr.bf16.mxu1 %v2485_v0 }
 0x263   :  { %2288 = vmatpush3.bf16.msra.mxu1 %v2683_v30 }
 0x264   :  { %2289 = vmatprep.subr.bf16.mxu1 %v2485_v0 }
 0x267   :  { %2291 = vmatpush3.bf16.msra.mxu1 %v2685_v33 }
 0x268   :  { %2292 = vmatprep.subr.bf16.mxu1 %v2485_v0 }
 0x26b   :  { %2294 = vmatpush3.bf16.msra.mxu1 %v2687_v36 }
 0x26c   :  { %2295 = vmatprep.subr.bf16.mxu1 %v2485_v0 }
 0x26f   :  { %2297 = vmatpush3.bf16.msra.mxu1 %v2689_v37 }
 0x270   :  { %2298 = vmatprep.subr.bf16.mxu1 %v2485_v0 }
 0x273   :  { %2300 = vmatpush3.bf16.msra.mxu1 %v2692_v38 }
 0x274   :  { %2301 = vmatprep.subr.bf16.mxu1 %v2485_v0 }
 0x276   :  { %2000 = vmatmul.mubr.f32.vlgmr.msra.gmra.mrb[0].mxu1 %v2860_v62 }
 0x277   :  { %2303 = vmatpush3.bf16.msra.mxu1 %v2571_v12  ;;  %2034 = vmatprep.mubr.msk.f32.mxu1 %vm2486_vm0, %v2487_v1 }
 0x278   :  { %2304 = vmatprep.subr.bf16.mxu1 %v2485_v0 }
 0x27b   :  { %2306 = vmatpush3.bf16.msra.mxu1 %v2574_v13 }
 0x27c   :  { %2307 = vmatprep.subr.bf16.mxu1 %v2485_v0 }
 0x27f   :  { %2309 = vmatpush3.bf16.msra.mxu1 %v2580_v18 }
 0x280   :  { %2310 = vmatprep.subr.bf16.mxu1 %v2485_v0 }
 0x283   :  { %2312 = vmatpush3.bf16.msra.mxu1 %v2591_v32 }
 0x284   :  { %2313 = vmatprep.subr.bf16.mxu1 %v2485_v0 }
 0x287   :  { %2315 = vmatpush3.bf16.msra.mxu1 %v2607_v44  ;;  %v1412_v44 = vld [vmem:[#allocation5] ss:$0 sm:$0xff] }
 0x288   :  { %2316 = vmatprep.subr.bf16.mxu1 %v2485_v0 }
 0x28b   :  { %2318 = vmatpush3.bf16.msra.mxu1 %v2618_v49 }
 0x28c   :  { %2319 = vmatprep.subr.bf16.mxu1 %v2485_v0 }
 0x28f   :  { %2321 = vmatpush3.bf16.msra.mxu1 %v2620_v50 }
 0x290   :  { %2322 = vmatprep.subr.bf16.mxu1 %v2485_v0 }
 0x293   :  { %2324 = vmatpush3.bf16.msra.mxu1 %v2622_v51 }
 0x296   :  { %2035 = vmatmul.mubr.f32.vlgmr.msra.gmra.mrb[0].mxu1 %v2860_v62 }
 0x369   :  { %v1367_v1 = vpop.f32.mrb[0].mxu1 }
 0x36a   :  { %v1371_v12 = vmul.f32 0.03125, %v1367_v1  ;;  %v2036_v13 = vpop.f32.mrb[1].mxu1 }
 0x36c   :  { %v1372_v18 = vadd.f32 1e-05, %v1371_v12 }
 0x36e   :  { %2357 = vrsqrt.f32 %v1372_v18 }
 0x378   :  { %v2358_v22 = vpop.eup %2357 }
 0x379   :  { %v1376_v32 = vmul.f32 %v2358_v22, %v2856_v59 }
 0x37b   :  { %v1383_v49 = vmul.f32 %v1411_v31, %v1376_v32 }
 0x37d   :  { %v1390_v5 = vadd.f32 %v1412_v44, %v1383_v49 }
 0x37f   :  { %1391 = vst [vmem:[#allocation10] sm:$0xff] %v1390_v5 }
 0x380   :  { %1396 = vsyncadd [#allocation4], 64  ;;  %s2488_s3 = smov [#allocation10]  }
 0x381   :  { %s1397_s14 = sshll.u32 %s2488_s3, 4  ;;  %s1398_s14 = int_to_ptr.vmem [resolvable:$true] %s1397_s14 }
 0x382   :  { %s2447_s15 = scalar_lea.vmem %s1398_s14, 64  ;;  %s2451_s16 = scalar_lea.vmem %s1398_s14, 128 }
 0x383   :  { %p2448_p4 = scmp.ne.s32.totalorder %s1398_s14, %s2447_s15  ;;  %p2452_p5 = scmp.lt.s32.totalorder %s1398_s14, %s1398_s14 }
 0x384   :  { %p2453_p6 = scmp.lt.s32.totalorder %s2451_s16, %s2447_s15 }
 0x386   :  { %p2454_p7 = por %p2453_p6, %p2452_p5 }
 0x388   :  { %p2455_p8 = pnand %p2454_p7, %p2448_p4 }
 0x38a   :  { %2458 = shalt.err (!%p2455_p8)
}
 0x38b   :  { %s2459_s20 = scalar_lea.hbm %s2975_s4, 64 }
 0x38c   :  { %p2460_p9 = scmp.ne.s32.totalorder %s2975_s4, %s2459_s20  ;;  %p2463_p10 = scmp.lt.u32.totalorder %s2459_s20, %s2975_s4 }
 0x38e   :  { %p2465_p11 = pnand %p2463_p10, %p2460_p9 }
 0x390   :  { %2468 = shalt.err (!%p2465_p11)
}
 0x391   :  { %1403 = dma.vmem_to_hbm [thread:$0]  %s1398_s14, 64, %s2975_s4, [#allocation4], %s2483_s11, %s2483_s11, %s2484_s12  }
 0x392   :  { %2475 = dma.done.wait [#allocation4], 128  }
 0x393   :  { %2476 = vsyncadd [#allocation4], 4294967168 }
 0x394   :  { %1407 = vsyncpa [#allocation3], 1 }
 0x395   :  { %1408 = vsyncpa [#allocation6], 1 }
 0x396   :  { %1409 = vsyncpa [#allocation9], 1 }
 0x397   :  { %1410 = vsyncpa [#allocation4], 1 }

</bundles_post_ra>
